<compile_context>
chip_gen: v6e
topology: v6e:2x2x1
jax: 0.10.0
libtpu: 0.0.40
codegen_flags: <defaults>
</compile_context>

<pallas_src>
import jax
import jax.numpy as jnp
from jax.experimental import pallas as pl
from jax.experimental.pallas import tpu as pltpu


def _qnet_kernel(xt_ref, w1_ref, b1_ref, wh_ref, bh_ref, meant_ref, logvart_ref):
    # Transposed ("batch on lanes") layout: x^T (S, TB), h^T (H, TB), out^T (2A, TB).
    xt = xt_ref[...]
    h = jnp.dot(w1_ref[...], xt, preferred_element_type=jnp.float32)          # (H, TB)
    h = jnp.maximum(h + b1_ref[...], 0.0)                                     # bias col + ReLU
    out = jnp.dot(wh_ref[...], h, preferred_element_type=jnp.float32) + bh_ref[...]  # (2A, TB)
    a = meant_ref.shape[0]
    # Sublane row-slices (A is a multiple of 8 here -> tile-aligned, free).
    meant_ref[...] = out[:a, :].astype(meant_ref.dtype)
    logvart_ref[...] = out[a:, :].astype(logvart_ref.dtype)


def _round_up(x, m):
    return (x + m - 1) // m * m


def _choose_batch_tile(B, S, H, A2, vmem_budget_bytes):
    """Lane-axis (batch) tile size.

    Budget: double-buffered x^T and both output tiles + single-buffered hidden
    activation, all f32. Small batches run as one full-array block; large
    batches are split into >= 2 tiles (megacore on v7x) capped by the budget.
    """
    per_col = 4 * (2 * S + H + 2 * A2)                       # f32 bytes / batch column
    tb = max(256, (vmem_budget_bytes // per_col) // 256 * 256)
    if B <= 2048:
        return B                                             # single full block
    tb = min(tb, _round_up(pl.cdiv(B, 2), 256))              # >= 2 parallel steps
    return tb


def mean_variance_qnet(state, params, *, vmem_budget_bytes=8 * 1024 * 1024):
    """state: (B, state_dim) f32.  params: PyTorch-layout weights (see init_params).

    Returns (mean, logvar), each (B, action_dim) f32 — matching the nn.Module.
    """
    B, S = state.shape
    H, _ = params["w1"].shape
    A2, _ = params["w_heads"].shape
    A = A2 // 2

    # Batch-on-lanes layout. In production the caller would keep activations in
    # this layout end-to-end; here we transpose at the module boundary only.
    x_t = jnp.transpose(state)                               # (S, B)

    TB = _choose_batch_tile(B, S, H, A2, vmem_budget_bytes)
    grid = (pl.cdiv(B, TB),)

    cost = pl.CostEstimate(
        flops=2 * B * (S * H + H * A2),
        transcendentals=0,
        bytes_accessed=4 * (B * S + H * S + H + A2 * H + A2 + B * A2),
    )

    mean_t, logvar_t = pl.pallas_call(
        _qnet_kernel,
        out_shape=(
            jax.ShapeDtypeStruct((A, B), jnp.float32),
            jax.ShapeDtypeStruct((A, B), jnp.float32),
        ),
        grid=grid,
        in_specs=[
            pl.BlockSpec((S, TB), lambda i: (0, i)),    # state^T tile (batch on lanes)
            pl.BlockSpec((H, S), lambda i: (0, 0)),     # W1 (resident across steps)
            pl.BlockSpec((H, 1), lambda i: (0, 0)),     # b1 column
            pl.BlockSpec((A2, H), lambda i: (0, 0)),    # fused [Wm; Wv] (resident)
            pl.BlockSpec((A2, 1), lambda i: (0, 0)),    # fused [bm; bv] column
        ],
        out_specs=[
            pl.BlockSpec((A, TB), lambda i: (0, i)),    # mean^T
            pl.BlockSpec((A, TB), lambda i: (0, i)),    # logvar^T
        ],
        compiler_params=pltpu.CompilerParams(
            dimension_semantics=("parallel",),
            vmem_limit_bytes=32 * 1024 * 1024,
        ),
        cost_estimate=cost,
    )(x_t, params["w1"], params["b1"], params["w_heads"], params["b_heads"])

    # Boundary transposes back to the PyTorch (B, A) interface; a fused consumer
    # would instead keep the lane-dense (A, B) slabs.
    return jnp.transpose(mean_t), jnp.transpose(logvar_t)


def init_params(key, state_dim, action_dim, hidden_dim):
    """PyTorch-nn.Linear-style uniform fan-in init, stored in (out, in) layout.

    The two heads are fused row-wise into a single (2*action_dim, hidden) weight
    and a (2*action_dim, 1) bias column so the kernel runs one head matmul.
    """
    ks = jax.random.split(key, 6)

    def lin(kw, kb, fan_in, fan_out):
        bound = 1.0 / float(fan_in) ** 0.5
        w = jax.random.uniform(kw, (fan_out, fan_in), jnp.float32, -bound, bound)
        b = jax.random.uniform(kb, (fan_out, 1), jnp.float32, -bound, bound)
        return w, b

    w1, b1 = lin(ks[0], ks[1], state_dim, hidden_dim)
    wm, bm = lin(ks[2], ks[3], hidden_dim, action_dim)
    wv, bv = lin(ks[4], ks[5], hidden_dim, action_dim)
    return {
        "w1": w1,                                            # (H, S)
        "b1": b1,                                            # (H, 1)
        "w_heads": jnp.concatenate([wm, wv], axis=0),        # (2A, H)
        "b_heads": jnp.concatenate([bm, bv], axis=0),        # (2A, 1)
    }


def reference(state, p):
    A = p["w_heads"].shape[0] // 2
    h = jnp.maximum(state @ p["w1"].T + p["b1"].T, 0.0)
    out = h @ p["w_heads"].T + p["b_heads"].T
    return out[:, :A], out[:, A:]


if __name__ == "__main__":
    # Module-default hidden_dim=128; small demo batch / dims.
    B, state_dim, action_dim, hidden_dim = 2, 4, 8, 128

    key = jax.random.PRNGKey(0)
    k_x, k_p = jax.random.split(key)
    state = jax.random.normal(k_x, (B, state_dim), jnp.float32)
    params = init_params(k_p, state_dim, action_dim, hidden_dim)

    mean, logvar = mean_variance_qnet(state, params)
    jax.block_until_ready((mean, logvar))

    mean_ref, logvar_ref = reference(state, params)
    assert mean.shape == (B, action_dim) and logvar.shape == (B, action_dim)
    # Tolerance covers default-precision (bf16-pass) MXU matmuls on TPU.
    assert jnp.allclose(mean, mean_ref, atol=2e-3, rtol=2e-3)
    assert jnp.allclose(logvar, logvar_ref, atol=2e-3, rtol=2e-3)

    # Exercise the batch-tiled, megacore-parallel path (grid of 2 x 4096-lane tiles).
    B2 = 8192
    state_big = jax.random.normal(jax.random.PRNGKey(1), (B2, state_dim), jnp.float32)
    mean_b, logvar_b = mean_variance_qnet(state_big, params)
    jax.block_until_ready((mean_b, logvar_b))
    mean_b_ref, logvar_b_ref = reference(state_big, params)
    assert jnp.allclose(mean_b, mean_b_ref, atol=2e-3, rtol=2e-3)
    assert jnp.allclose(logvar_b, logvar_b_ref, atol=2e-3, rtol=2e-3)

    print("KERNEL_OK")
</pallas_src>

<mosaic_0001>
module attributes {stable_mosaic.version = 11 : i64} {
  func.func @_qnet_kernel(%arg0: i32, %arg1: memref<4x2xf32, #tpu.memory_space<vmem>>, %arg2: memref<128x4xf32, #tpu.memory_space<vmem>>, %arg3: memref<128x1xf32, #tpu.memory_space<vmem>>, %arg4: memref<16x128xf32, #tpu.memory_space<vmem>>, %arg5: memref<16x1xf32, #tpu.memory_space<vmem>>, %arg6: memref<8x2xf32, #tpu.memory_space<vmem>>, %arg7: memref<8x2xf32, #tpu.memory_space<vmem>>) attributes {dimension_semantics = [#tpu.dimension_semantics<parallel>], iteration_bounds = array<i64: 1>, scalar_prefetch = 0 : i64, scratch_operands = 0 : i64, tpu.core_type = #tpu.core_type<tc>, window_params = [{transform_indices = @transform_0, window_bounds = array<i64: 4, 2>}, {pipeline_mode = #tpu.pipeline_mode<synchronous>, transform_indices = @transform_1, window_bounds = array<i64: 128, 4>}, {pipeline_mode = #tpu.pipeline_mode<synchronous>, transform_indices = @transform_2, window_bounds = array<i64: 128, 1>}, {pipeline_mode = #tpu.pipeline_mode<synchronous>, transform_indices = @transform_3, window_bounds = array<i64: 16, 128>}, {pipeline_mode = #tpu.pipeline_mode<synchronous>, transform_indices = @transform_4, window_bounds = array<i64: 16, 1>}, {transform_indices = @transform_5, window_bounds = array<i64: 8, 2>}, {transform_indices = @transform_6, window_bounds = array<i64: 8, 2>}]} {
    %c0 = arith.constant 0 : index
    %c0_0 = arith.constant 0 : index
    %0 = vector.load %arg1[%c0, %c0_0] : memref<4x2xf32, #tpu.memory_space<vmem>>, vector<4x2xf32>
    %c0_1 = arith.constant 0 : index
    %c0_2 = arith.constant 0 : index
    %1 = vector.load %arg2[%c0_1, %c0_2] : memref<128x4xf32, #tpu.memory_space<vmem>>, vector<128x4xf32>
    %cst = arith.constant dense<0.000000e+00> : vector<128x2xf32>
    %2 = tpu.matmul %1, %0, %cst {dimension_numbers = #tpu.dot_dimension_numbers<[1], [0], [0], [1], [0, 0, 1, 1], [], []>} : vector<128x4xf32>, vector<4x2xf32>, vector<128x2xf32> -> vector<128x2xf32>
    %c0_3 = arith.constant 0 : index
    %c0_4 = arith.constant 0 : index
    %3 = vector.load %arg3[%c0_3, %c0_4] : memref<128x1xf32, #tpu.memory_space<vmem>>, vector<128x1xf32>
    %4 = vector.broadcast %3 : vector<128x1xf32> to vector<128x2xf32>
    %5 = arith.addf %2, %4 : vector<128x2xf32>
    %cst_5 = arith.constant 0.000000e+00 : f32
    %6 = vector.broadcast %cst_5 : f32 to vector<128x2xf32>
    %7 = arith.maximumf %5, %6 : vector<128x2xf32>
    %c0_6 = arith.constant 0 : index
    %c0_7 = arith.constant 0 : index
    %8 = vector.load %arg4[%c0_6, %c0_7] : memref<16x128xf32, #tpu.memory_space<vmem>>, vector<16x128xf32>
    %cst_8 = arith.constant dense<0.000000e+00> : vector<16x2xf32>
    %9 = tpu.matmul %8, %7, %cst_8 {dimension_numbers = #tpu.dot_dimension_numbers<[1], [0], [0], [1], [0, 0, 1, 1], [], []>} : vector<16x128xf32>, vector<128x2xf32>, vector<16x2xf32> -> vector<16x2xf32>
    %c0_9 = arith.constant 0 : index
    %c0_10 = arith.constant 0 : index
    %10 = vector.load %arg5[%c0_9, %c0_10] : memref<16x1xf32, #tpu.memory_space<vmem>>, vector<16x1xf32>
    %11 = vector.broadcast %10 : vector<16x1xf32> to vector<16x2xf32>
    %12 = arith.addf %9, %11 : vector<16x2xf32>
    %13 = vector.extract_strided_slice %12 {offsets = [0, 0], sizes = [8, 2], strides = [1, 1]} : vector<16x2xf32> to vector<8x2xf32>
    %c0_11 = arith.constant 0 : index
    %c0_12 = arith.constant 0 : index
    %14 = vector.load %arg6[%c0_11, %c0_12] : memref<8x2xf32, #tpu.memory_space<vmem>>, vector<8x2xf32>
    tpu.vector_store %arg6[%c0_11, %c0_12], %13 {strides = array<i32>} : memref<8x2xf32, #tpu.memory_space<vmem>>, vector<8x2xf32>,
    %15 = vector.extract_strided_slice %12 {offsets = [8, 0], sizes = [8, 2], strides = [1, 1]} : vector<16x2xf32> to vector<8x2xf32>
    %c0_13 = arith.constant 0 : index
    %c0_14 = arith.constant 0 : index
    %16 = vector.load %arg7[%c0_13, %c0_14] : memref<8x2xf32, #tpu.memory_space<vmem>>, vector<8x2xf32>
    tpu.vector_store %arg7[%c0_13, %c0_14], %15 {strides = array<i32>} : memref<8x2xf32, #tpu.memory_space<vmem>>, vector<8x2xf32>,
    return
  }
  func.func @transform_0(%arg0: i32) -> (i32, i32) {
    %c0_i32 = arith.constant 0 : i32
    %c0_i32_0 = arith.constant 0 : i32
    return %c0_i32, %arg0 : i32, i32
  }
  func.func @transform_1(%arg0: i32) -> (i32, i32) {
    %c0_i32 = arith.constant 0 : i32
    %c0_i32_0 = arith.constant 0 : i32
    %c0_i32_1 = arith.constant 0 : i32
    return %c0_i32, %c0_i32_0 : i32, i32
  }
  func.func @transform_2(%arg0: i32) -> (i32, i32) {
    %c0_i32 = arith.constant 0 : i32
    %c0_i32_0 = arith.constant 0 : i32
    %c0_i32_1 = arith.constant 0 : i32
    return %c0_i32, %c0_i32_0 : i32, i32
  }
  func.func @transform_3(%arg0: i32) -> (i32, i32) {
    %c0_i32 = arith.constant 0 : i32
    %c0_i32_0 = arith.constant 0 : i32
    %c0_i32_1 = arith.constant 0 : i32
    return %c0_i32, %c0_i32_0 : i32, i32
  }
  func.func @transform_4(%arg0: i32) -> (i32, i32) {
    %c0_i32 = arith.constant 0 : i32
    %c0_i32_0 = arith.constant 0 : i32
    %c0_i32_1 = arith.constant 0 : i32
    return %c0_i32, %c0_i32_0 : i32, i32
  }
  func.func @transform_5(%arg0: i32) -> (i32, i32) {
    %c0_i32 = arith.constant 0 : i32
    %c0_i32_0 = arith.constant 0 : i32
    return %c0_i32, %arg0 : i32, i32
  }
  func.func @transform_6(%arg0: i32) -> (i32, i32) {
    %c0_i32 = arith.constant 0 : i32
    %c0_i32_0 = arith.constant 0 : i32
    return %c0_i32, %arg0 : i32, i32
  }
}

</mosaic_0001>

<bundles_post_ra>
// kernel: tpu_custom_call.1
= control target key start
LH: loop header
LB: loop body
LE: loop exit
PB: predicated region body
PF: predicated region fallthrough
CT: control target
= control target key end

     0   :  { %vm184_vm0 = vcmask 1043456   ;;  %vm135_vm1 = vcmask 31744   ;;  %v565_v3 = vmov 0   ;;  %vm438_vm2 = vcmask 15360   ;;  %s746_s0 = inlined_call_operand.vmem [shape: f32[4,2], index: 0, kind: input, shape index: {}]   ;;  %s747_s1 = inlined_call_operand.vmem [shape: f32[128,4], index: 1, kind: input, shape index: {}]   ;;  %s748_s2 = inlined_call_operand.vmem [shape: f32[128,1], index: 2, kind: input, shape index: {}]   ;;  %s749_s4 = inlined_call_operand.vmem [shape: f32[16,1], index: 4, kind: input, shape index: {}]   ;;  %s750_s3 = inlined_call_operand.vmem [shape: f32[16,128], index: 3, kind: input, shape index: {}]   ;;  %s751_s6 = inlined_call_operand.vmem [shape: f32[8,2], index: 6, kind: output, shape index: {1}]   ;;  %s752_s5 = inlined_call_operand.vmem [shape: f32[8,2], index: 5, kind: output, shape index: {0}]  }
   0x1   :  { %v22_v0 = vld [vmem:[%s746_s0] sm:$0xf]  ;;  %v24_v2 = vld [vmem:[%s747_s1 + $0x8] sm:$0xff]  ;;  %563 = vset.pattern.permute.xlu0 %v565_v3  ;;  %564 = vset.pattern.permute.xlu1 %v565_v3  ;;  %v25_v4 = vld [vmem:[%s747_s1 + $0x10] sm:$0xff] }
   0x2   :  { %v23_v1 = vld [vmem:[%s747_s1] sm:$0xff]  ;;  %501 = vmatprep.subr.msk.mxu0 %vm184_vm0, %v22_v0  ;;  %v26_v5 = vld [vmem:[%s747_s1 + $0x18] sm:$0xff]  ;;  %v52_v8 = vld [vmem:[%s748_s2 + $0x68] sm:$0xff] }
   0x3   :  { %503 = vmatprep.mubr.msk.f32.mxu0 %vm135_vm1, %v23_v1  ;;  %502 = vmatpush3.msk.msra.mxu0 %vm184_vm0, %v22_v0  ;;  %v27_v6 = vld [vmem:[%s747_s1 + $0x20] sm:$0xff]  ;;  %v54_v7 = vld [vmem:[%s748_s2 + $0x78] sm:$0xff]  ;;  %v53_v9 = vld [vmem:[%s748_s2 + $0x70] sm:$0xff] }
   0x4   :  { %504 = vmatmul.mubr.msk.f32.vlgmr.msra.gmra.mxu0 %vm135_vm1, %v24_v2  ;;  %132 = vperm.xlu0 %563, %v54_v7   ;;  %v28_v10 = vld [vmem:[%s747_s1 + $0x28] sm:$0xff]  ;;  %v51_v11 = vld [vmem:[%s748_s2 + $0x60] sm:$0xff]  ;;  %v29_v12 = vld [vmem:[%s747_s1 + $0x30] sm:$0xff] }
   0x5   :  { %506 = vmatprep.mubr.msk.f32.mxu0 %vm135_vm1, %v25_v4  ;;  %122 = vperm.xlu1 %564, %v52_v8   ;;  %v50_v13 = vld [vmem:[%s748_s2 + $0x58] sm:$0xff]  ;;  %v49_v15 = vld [vmem:[%s748_s2 + $0x50] sm:$0xff]  ;;  %v31_v16 = vld [vmem:[%s747_s1 + $0x40] sm:$0xff] }
   0x6   :  { %v30_v14 = vld [vmem:[%s747_s1 + $0x38] sm:$0xff]  ;;  %v48_v17 = vld [vmem:[%s748_s2 + $0x48] sm:$0xff]  ;;  %v47_v19 = vld [vmem:[%s748_s2 + $0x40] sm:$0xff] }
   0x7   :  { %v32_v18 = vld [vmem:[%s747_s1 + $0x48] sm:$0xff]  ;;  %v33_v20 = vld [vmem:[%s747_s1 + $0x50] sm:$0xff]  ;;  %v46_v21 = vld [vmem:[%s748_s2 + $0x38] sm:$0xff] }
   0x8   :  { %507 = vmatmul.mubr.msk.f32.gmra.mxu0 %vm135_vm1, %v26_v5  ;;  %127 = vperm.xlu0 %563, %v53_v9   ;;  %v34_v22 = vld [vmem:[%s747_s1 + $0x58] sm:$0xff]  ;;  %v45_v23 = vld [vmem:[%s748_s2 + $0x30] sm:$0xff]  ;;  %v35_v24 = vld [vmem:[%s747_s1 + $0x60] sm:$0xff] }
   0x9   :  { %509 = vmatprep.mubr.msk.f32.mxu0 %vm135_vm1, %v27_v6  ;;  %117 = vperm.xlu1 %564, %v51_v11   ;;  %v44_v25 = vld [vmem:[%s748_s2 + $0x28] sm:$0xff]  ;;  %v43_v27 = vld [vmem:[%s748_s2 + $0x20] sm:$0xff]  ;;  %v37_v28 = vld [vmem:[%s747_s1 + $0x70] sm:$0xff] }
   0xa   :  { %v36_v26 = vld [vmem:[%s747_s1 + $0x68] sm:$0xff]  ;;  %v42_v29 = vld [vmem:[%s748_s2 + $0x18] sm:$0xff]  ;;  %v41_v31 = vld [vmem:[%s748_s2 + $0x10] sm:$0xff] }
   0xb   :  { %v38_v30 = vld [vmem:[%s747_s1 + $0x78] sm:$0xff]  ;;  %v40_v32 = vld [vmem:[%s748_s2 + $0x8] sm:$0xff]  ;;  %v39_v33 = vld [vmem:[%s748_s2] sm:$0xff] }
   0xc   :  { %510 = vmatmul.mubr.msk.f32.gmra.mxu0 %vm135_vm1, %v28_v10  ;;  %112 = vperm.xlu0 %563, %v50_v13   ;;  %v351_v34 = vld [vmem:[%s749_s4] sm:$0xff]  ;;  %v352_v35 = vld [vmem:[%s749_s4 + $0x8] sm:$0xff] }
   0xd   :  { %512 = vmatprep.mubr.msk.f32.mxu0 %vm135_vm1, %v29_v12  ;;  %107 = vperm.xlu1 %564, %v49_v15   ;;  %v349_v36 = vld [vmem:[%s750_s3] sm:$0xff] }
   0xe   :  { %559 = vmatprep.mubr.f32.mxu1 %v349_v36 }
  0x10   :  { %513 = vmatmul.mubr.msk.f32.gmra.mxu0 %vm135_vm1, %v30_v14  ;;  %102 = vperm.xlu0 %563, %v48_v17  }
  0x11   :  { %515 = vmatprep.mubr.msk.f32.mxu0 %vm135_vm1, %v31_v16  ;;  %97 = vperm.xlu1 %564, %v47_v19  }
  0x14   :  { %516 = vmatmul.mubr.msk.f32.gmra.mxu0 %vm135_vm1, %v32_v18  ;;  %92 = vperm.xlu0 %563, %v46_v21  }
  0x15   :  { %518 = vmatprep.mubr.msk.f32.mxu0 %vm135_vm1, %v33_v20  ;;  %87 = vperm.xlu1 %564, %v45_v23  }
  0x18   :  { %519 = vmatmul.mubr.msk.f32.gmra.mxu0 %vm135_vm1, %v34_v22  ;;  %82 = vperm.xlu0 %563, %v44_v25  }
  0x19   :  { %521 = vmatprep.mubr.msk.f32.mxu0 %vm135_vm1, %v35_v24  ;;  %77 = vperm.xlu1 %564, %v43_v27  }
  0x1c   :  { %522 = vmatmul.mubr.msk.f32.gmra.mxu0 %vm135_vm1, %v36_v26  ;;  %72 = vperm.xlu0 %563, %v42_v29  }
  0x1d   :  { %524 = vmatprep.mubr.msk.f32.mxu0 %vm135_vm1, %v37_v28  ;;  %67 = vperm.xlu1 %564, %v41_v31  }
  0x20   :  { %525 = vmatmul.mubr.msk.f32.gmra.mxu0 %vm135_vm1, %v38_v30  ;;  %62 = vperm.xlu0 %563, %v40_v32  }
  0x21   :  { %57 = vperm.xlu1 %564, %v39_v33  }
  0x24   :  { %355 = vperm.xlu0 %563, %v351_v34  }
  0x25   :  { %360 = vperm.xlu1 %564, %v352_v35  }
  0x7f   :  { %v133_v42 = vpop.permute.xlu0 %132 }
  0x80   :  { %v123_v44 = vpop.permute.xlu1 %122 }
  0x83   :  { %v128_v47 = vpop.permute.xlu0 %127 }
  0x84   :  { %v118_v49 = vpop.permute.xlu1 %117 }
  0x87   :  { %v113_v52 = vpop.permute.xlu0 %112 }
  0x88   :  { %v108_v54 = vpop.permute.xlu1 %107 }
  0x8b   :  { %v103_v57 = vpop.permute.xlu0 %102 }
  0x8c   :  { %v98_v60 = vpop.permute.xlu1 %97 }
  0x8f   :  { %v93_v3 = vpop.permute.xlu0 %92 }
  0x90   :  { %v88_v6 = vpop.permute.xlu1 %87 }
  0x93   :  { %v83_v11 = vpop.permute.xlu0 %82 }
  0x94   :  { %v78_v14 = vpop.permute.xlu1 %77 }
  0x97   :  { %v73_v19 = vpop.permute.xlu0 %72 }
  0x98   :  { %v68_v22 = vpop.permute.xlu1 %67 }
  0x9b   :  { %v63_v27 = vpop.permute.xlu0 %62 }
  0x9c   :  { %v58_v30 = vpop.permute.xlu1 %57 }
  0xc4   :  { %v725_v37 = vpop.f32.mrf.mxu0 }
  0xc5   :  { %v260_v31 = vadd.f32 %v725_v37, %v63_v27  ;;  %v361_v37 = vpop.permute.xlu1 %360 }
  0xc6   :  { %v727_v38 = vpop.f32.mrf.mxu0 }
  0xc7   :  { %v255_v33 = vadd.f32 %v727_v38, %v58_v30  ;;  %v334_v35 = vmax.f32 %v260_v31, 0.0 }
  0xc8   :  { %v729_v39 = vpop.f32.mrf.mxu0 }
  0xc9   :  { %v270_v25 = vadd.f32 %v729_v39, %v73_v19  ;;  %v333_v36 = vmax.f32 %v255_v33, 0.0  ;;  %v350_v39 = vld [vmem:[%s750_s3 + $0x8] sm:$0xff] }
  0xca   :  { %v731_v40 = vpop.f32.mrf.mxu0 }
  0xcb   :  { %v265_v28 = vadd.f32 %v731_v40, %v68_v22  ;;  %v336_v32 = vmax.f32 %v270_v25, 0.0 }
  0xcc   :  { %v511_v41 = vpop.f32.mrf.mxu0 }
  0xcd   :  { %v280_v20 = vadd.f32 %v511_v41, %v83_v11  ;;  %v335_v34 = vmax.f32 %v265_v28, 0.0  ;;  %v356_v41 = vpop.permute.xlu0 %355 }
  0xce   :  { %v274_v43 = vpop.f32.mrf.mxu0 }
  0xcf   :  { %v275_v23 = vadd.f32 %v274_v43, %v78_v14  ;;  %v338_v26 = vmax.f32 %v280_v20, 0.0 }
  0xd0   :  { %v514_v45 = vpop.f32.mrf.mxu0 }
  0xd1   :  { %v290_v15 = vadd.f32 %v514_v45, %v93_v3  ;;  %v337_v29 = vmax.f32 %v275_v23, 0.0 }
  0xd2   :  { %v284_v46 = vpop.f32.mrf.mxu0 }
  0xd3   :  { %v285_v17 = vadd.f32 %v284_v46, %v88_v6  ;;  %v340_v21 = vmax.f32 %v290_v15, 0.0 }
  0xd4   :  { %v517_v48 = vpop.f32.mrf.mxu0 }
  0xd5   :  { %v300_v9 = vadd.f32 %v517_v48, %v103_v57  ;;  %v339_v24 = vmax.f32 %v285_v17, 0.0 }
  0xd6   :  { %v294_v50 = vpop.f32.mrf.mxu0 }
  0xd7   :  { %v295_v12 = vadd.f32 %v294_v50, %v98_v60  ;;  %v342_v16 = vmax.f32 %v300_v9, 0.0 }
  0xd8   :  { %v520_v51 = vpop.f32.mrf.mxu0 }
  0xd9   :  { %v310_v4 = vadd.f32 %v520_v51, %v113_v52  ;;  %v341_v18 = vmax.f32 %v295_v12, 0.0 }
  0xda   :  { %v304_v53 = vpop.f32.mrf.mxu0 }
  0xdb   :  { %v305_v7 = vadd.f32 %v304_v53, %v108_v54  ;;  %v344_v10 = vmax.f32 %v310_v4, 0.0 }
  0xdc   :  { %v523_v55 = vpop.f32.mrf.mxu0 }
  0xdd   :  { %v320_v62 = vadd.f32 %v523_v55, %v123_v44  ;;  %v343_v13 = vmax.f32 %v305_v7, 0.0 }
  0xde   :  { %v314_v56 = vpop.f32.mrf.mxu0 }
  0xdf   :  { %v315_v1 = vadd.f32 %v314_v56, %v118_v49  ;;  %v346_v5 = vmax.f32 %v320_v62, 0.0 }
  0xe0   :  { %v526_v58 = vpop.f32.mrf.mxu0 }
  0xe1   :  { %v330_v59 = vadd.f32 %v526_v58, %v133_v42  ;;  %v345_v8 = vmax.f32 %v315_v1, 0.0 }
  0xe2   :  { %v324_v61 = vpop.f32.mrf.mxu0 }
  0xe3   :  { %v348_v63 = vmax.f32 %v330_v59, 0.0  ;;  %v325_v0 = vadd.f32 %v324_v61, %v128_v47 }
  0xe5   :  { %v347_v2 = vmax.f32 %v325_v0, 0.0  ;;  %527 = vmatprep.subr.mxu1 %v348_v63 }
  0xe6   :  { %528 = vmatpush3.msra.mxu1 %v348_v63 }
  0xe7   :  { %529 = vmatprep.subr.mxu1 %v347_v2 }
  0xe8   :  { %530 = vmatpush3.msra.mxu1 %v347_v2 }
  0xe9   :  { %531 = vmatprep.subr.mxu1 %v346_v5 }
  0xea   :  { %532 = vmatpush3.msra.mxu1 %v346_v5 }
  0xeb   :  { %533 = vmatprep.subr.mxu1 %v345_v8 }
  0xec   :  { %534 = vmatpush3.msra.mxu1 %v345_v8 }
  0xed   :  { %535 = vmatprep.subr.mxu1 %v344_v10 }
  0xee   :  { %536 = vmatpush3.msra.mxu1 %v344_v10 }
  0xef   :  { %537 = vmatprep.subr.mxu1 %v343_v13 }
  0xf0   :  { %538 = vmatpush3.msra.mxu1 %v343_v13 }
  0xf1   :  { %539 = vmatprep.subr.mxu1 %v342_v16 }
  0xf2   :  { %540 = vmatpush3.msra.mxu1 %v342_v16 }
  0xf3   :  { %541 = vmatprep.subr.mxu1 %v341_v18 }
  0xf4   :  { %542 = vmatpush3.msra.mxu1 %v341_v18 }
  0xf5   :  { %543 = vmatprep.subr.mxu1 %v340_v21 }
  0xf6   :  { %544 = vmatpush3.msra.mxu1 %v340_v21 }
  0xf7   :  { %545 = vmatprep.subr.mxu1 %v339_v24 }
  0xf8   :  { %546 = vmatpush3.msra.mxu1 %v339_v24 }
  0xf9   :  { %547 = vmatprep.subr.mxu1 %v338_v26 }
  0xfa   :  { %548 = vmatpush3.msra.mxu1 %v338_v26 }
  0xfb   :  { %549 = vmatprep.subr.mxu1 %v337_v29 }
  0xfc   :  { %550 = vmatpush3.msra.mxu1 %v337_v29 }
  0xfd   :  { %551 = vmatprep.subr.mxu1 %v336_v32 }
  0xfe   :  { %552 = vmatpush3.msra.mxu1 %v336_v32 }
  0xff   :  { %553 = vmatprep.subr.mxu1 %v335_v34 }
 0x100   :  { %554 = vmatpush3.msra.mxu1 %v335_v34 }
 0x101   :  { %555 = vmatprep.subr.mxu1 %v334_v35 }
 0x102   :  { %556 = vmatpush3.msra.mxu1 %v334_v35 }
 0x103   :  { %557 = vmatprep.subr.mxu1 %v333_v36 }
 0x104   :  { %558 = vmatpush3.msra.mxu1 %v333_v36 }
 0x105   :  { %560 = vmatmul.mubr.f32.vlgmr.msra.gmra.mxu1 %v350_v39 }
 0x1c5   :  { %v561_v40 = vpop.f32.mrf.mxu1 }
 0x1c6   :  { %v435_v38 = vadd.f32 %v561_v40, %v361_v37 }
 0x1c7   :  { %v429_v42 = vpop.f32.mrf.mxu1 }
 0x1c8   :  { %440 = vst.msk [vmem:[%s751_s6] sm:$0xff] %vm438_vm2, %v435_v38  ;;  %v430_v43 = vadd.f32 %v429_v42, %v356_v41 }
 0x1ca   :  { %439 = vst.msk [vmem:[%s752_s5] sm:$0xff] %vm438_vm2, %v430_v43 }

</bundles_post_ra>
